<compile_context>
chip_gen: v5e
topology: v5e:2x2
jax: 0.10.0
libtpu: 0.0.40
codegen_flags: <defaults>
</compile_context>

<pallas_src>
import jax
import jax.numpy as jnp
from jax.experimental import pallas as pl
from jax.experimental.pallas import tpu as pltpu

# ---------------- configuration (small, consistent with the module) ----------
LAYER_NUM = 6
IN_FEAT = 16
HIDDEN = 64
OUT_FEAT = 16
SKIPS = (4,)
N = 128          # number of input rows ("batch")

_TM_CANDIDATES = (2048, 1024, 512, 256, 128, 64, 32, 16, 8)


def _round_up(x, m):
    return ((x + m - 1) // m) * m


def _choose_tiling(n):
    """Pick (tm, n_pad): row tile and padded row count.

    Goals (perf review):
      * grid = n_pad // tm >= 2, and even when it costs little padding, so
        dimension_semantics=("parallel",) can use both v7x TensorCores;
      * tm as large as possible (cap 2048) to amortize per-step overhead;
      * tm a multiple of 8 (sublane-aligned); n zero-padded up to n_pad.
    """
    n8 = _round_up(max(n, 1), 8)
    best = None
    for tm in _TM_CANDIDATES:
        g = -(-n8 // tm)                      # cdiv
        if g < 2:
            continue
        n_pad = g * tm
        # prefer: even grid, then least padding waste, then largest tile
        key = (0 if g % 2 == 0 else 1, n_pad - n, -tm)
        if best is None or key < best[0]:
            best = (key, tm, n_pad)
    if best is None:                          # n <= 8: two 8-row tiles
        return 8, 16
    return best[1], best[2]


def _make_mlp_kernel(layer_num, skips):
    skips = tuple(sorted(skips))

    def kernel(x_ref, w_in_ref, w_h_ref, b_h_ref, w_out_ref, b_out_ref, o_ref):
        cdt = w_h_ref.dtype                               # compute (MXU operand) dtype
        inputs = x_ref[...]                               # (tm, in_feat), compute dtype
        # ---- layer 0 ----
        acc = jnp.dot(inputs, w_in_ref[0], preferred_element_type=jnp.float32)
        h = jnp.maximum(acc + b_h_ref[0:1, :], 0.0).astype(cdt)   # bf16 activations
        # ---- hidden layers 1 .. layer_num-1 ----
        skip_idx = 1
        for i in range(1, layer_num):
            acc = jnp.dot(h, w_h_ref[i - 1], preferred_element_type=jnp.float32)
            if i in skips:
                # cat([inputs, h]) @ W  ==  inputs @ W[:in] + h @ W[in:]
                acc = acc + jnp.dot(inputs, w_in_ref[skip_idx],
                                    preferred_element_type=jnp.float32)
                skip_idx += 1
            h = jnp.maximum(acc + b_h_ref[i:i + 1, :], 0.0).astype(cdt)
        # ---- output layer (lane-dense, padded to 128) + ReLU ----
        out = jnp.dot(h, w_out_ref[...], preferred_element_type=jnp.float32)
        out = jnp.maximum(out + b_out_ref[...], 0.0)
        o_ref[...] = out.astype(o_ref.dtype)              # bf16 store on prod path

    return kernel


def _pack_params(params, layer_num, skips, in_feat, hidden, out_pad, compute_dtype):
    """Consolidate per-layer (w, b) into 5 stacked/padded arrays for the kernel."""
    skips = tuple(sorted(skips))
    w0, b0 = params[0]
    w_in_list = [w0]                       # (in_feat, hidden) pieces
    w_h_list = []                          # (hidden, hidden) pieces
    b_h_list = [jnp.reshape(b0, (-1,))]
    for i in range(1, layer_num):
        w, b = params[i]
        if i in skips:
            w_in_list.append(w[:in_feat])      # rows for `inputs` in cat([inputs, x])
            w_h_list.append(w[in_feat:])       # rows for the running activation
        else:
            w_h_list.append(w)
        b_h_list.append(jnp.reshape(b, (-1,)))
    w_out, b_out = params[layer_num]
    out_feat = w_out.shape[1]
    # Zero padding of w_out/b_out + final ReLU (0 -> 0) keeps padded lanes zero.
    w_out_p = jnp.zeros((hidden, out_pad), jnp.float32).at[:, :out_feat].set(w_out)
    b_out_p = jnp.zeros((1, out_pad), jnp.float32).at[:, :out_feat].set(
        jnp.reshape(b_out, (1, -1)))
    return (
        jnp.stack(w_in_list).astype(compute_dtype),   # (1+n_skips, in_feat, hidden)
        jnp.stack(w_h_list).astype(compute_dtype),    # (layer_num-1, hidden, hidden)
        jnp.stack(b_h_list).astype(jnp.float32),      # (layer_num, hidden)
        w_out_p.astype(compute_dtype),                # (hidden, out_pad)
        b_out_p,                                      # (1, out_pad) f32
    )


def mlp_forward(x, params, *, layer_num=LAYER_NUM, skips=SKIPS,
                compute_dtype=jnp.bfloat16, out_dtype=None, tm=None):
    """params: list of (w, b); w already (in, out), b (1, out), length layer_num+1.

    compute_dtype=bf16 is the production path (MXU operands + activations +
    output in bf16, f32 accumulation); compute_dtype=f32 is test-only.
    """
    n, in_feat = x.shape
    hidden = params[0][0].shape[1]
    out_feat = params[layer_num][0].shape[1]
    out_pad = _round_up(out_feat, 128)
    out_dtype = compute_dtype if out_dtype is None else out_dtype
    skips = tuple(sorted(skips))
    assert all(0 < s < layer_num for s in skips), "skip layers must be in [1, layer_num)"

    if tm is None:
        tm, n_pad = _choose_tiling(n)
    else:
        assert tm % 8 == 0, "row tile must be a multiple of 8"
        n_pad = _round_up(n, tm)
        if n_pad // tm < 2:                 # keep >=2 grid steps for megacore
            n_pad = 2 * tm
    grid = (n_pad // tm,)

    w_in, w_h, b_h, w_out, b_out = _pack_params(
        params, layer_num, skips, in_feat, hidden, out_pad, compute_dtype)

    x_c = x.astype(compute_dtype)
    if n_pad != n:
        x_c = jnp.zeros((n_pad, in_feat), compute_dtype).at[:n].set(x_c)

    kernel = _make_mlp_kernel(layer_num, skips)

    out = pl.pallas_call(
        kernel,
        out_shape=jax.ShapeDtypeStruct((n_pad, out_pad), out_dtype),
        grid=grid,
        in_specs=[
            pl.BlockSpec((tm, in_feat), lambda i: (i, 0)),
            # Weights/biases: constant index_maps -> resident across grid steps.
            pl.BlockSpec(w_in.shape, lambda i: (0, 0, 0)),
            pl.BlockSpec(w_h.shape, lambda i: (0, 0, 0)),
            pl.BlockSpec(b_h.shape, lambda i: (0, 0)),
            pl.BlockSpec(w_out.shape, lambda i: (0, 0)),
            pl.BlockSpec(b_out.shape, lambda i: (0, 0)),
        ],
        out_specs=pl.BlockSpec((tm, out_pad), lambda i: (i, 0)),
        compiler_params=pltpu.CompilerParams(
            dimension_semantics=("parallel",)),
    )(x_c, w_in, w_h, b_h, w_out, b_out)

    # NOTE: if the consumer can accept the padded (n_pad, 128) slab directly,
    # drop this slice to save an extra HBM round trip.
    return out[:n, :out_feat]


def init_params(key, layer_num, in_feat, hidden, out_feat, skips):
    """PyTorch-Linear-like uniform init; w of shape (fan_in, fan_out), b (1, fan_out)."""
    params = []
    fan_ins = [in_feat] + [
        hidden + in_feat if i in skips else hidden for i in range(1, layer_num)
    ]
    dims = [(fi, hidden) for fi in fan_ins] + [(hidden, out_feat)]
    for fan_in, fan_out in dims:
        key, kw, kb = jax.random.split(key, 3)
        bound = 1.0 / jnp.sqrt(fan_in)
        w = jax.random.uniform(kw, (fan_in, fan_out), jnp.float32, -bound, bound)
        b = jax.random.uniform(kb, (1, fan_out), jnp.float32, -bound, bound)
        params.append((w, b))
    return params


def mlp_reference(x, params, *, layer_num=LAYER_NUM, skips=SKIPS):
    """Pure-JAX f32 reference mirroring the PyTorch forward."""
    inputs = x
    h = x
    for i in range(layer_num):
        if i in skips:
            h = jnp.concatenate([inputs, h], axis=-1)
        w, b = params[i]
        h = jnp.maximum(h @ w + b, 0.0)
    w, b = params[layer_num]
    return jnp.maximum(h @ w + b, 0.0)


def mlp_reference_bf16(x, params, *, layer_num=LAYER_NUM, skips=SKIPS):
    """Apples-to-apples reference for the production path: bf16 MXU operands,
    f32 accumulation, bf16 inter-layer activations, bf16 output, and the skip
    concat split into two matmuls exactly like the kernel."""
    skips = tuple(sorted(skips))
    bf = jnp.bfloat16
    in_feat = x.shape[-1]
    inputs = x.astype(bf)
    w0, b0 = params[0]
    acc = jnp.dot(inputs, w0.astype(bf), preferred_element_type=jnp.float32)
    h = jnp.maximum(acc + b0, 0.0).astype(bf)
    for i in range(1, layer_num):
        w, b = params[i]
        if i in skips:
            acc = (jnp.dot(h, w[in_feat:].astype(bf), preferred_element_type=jnp.float32)
                   + jnp.dot(inputs, w[:in_feat].astype(bf),
                             preferred_element_type=jnp.float32))
        else:
            acc = jnp.dot(h, w.astype(bf), preferred_element_type=jnp.float32)
        h = jnp.maximum(acc + b, 0.0).astype(bf)
    w, b = params[layer_num]
    out = jnp.dot(h, w.astype(bf), preferred_element_type=jnp.float32)
    return jnp.maximum(out + b, 0.0).astype(bf)


if __name__ == "__main__":
    key = jax.random.PRNGKey(0)
    key, kx = jax.random.split(key)
    x = jax.random.normal(kx, (N, IN_FEAT), jnp.float32)
    params = init_params(key, LAYER_NUM, IN_FEAT, HIDDEN, OUT_FEAT, SKIPS)

    # --- exactness check (test-only path): f32 operands, tight tolerance ---
    out_f32 = jax.block_until_ready(mlp_forward(x, params, compute_dtype=jnp.float32))
    ref = mlp_reference(x, params)
    assert out_f32.shape == (N, OUT_FEAT), out_f32.shape
    assert jnp.allclose(out_f32, ref, atol=1e-5, rtol=1e-5), \
        float(jnp.abs(out_f32 - ref).max())

    # --- padding / tiling path: batch not a multiple of the row tile ---
    n_odd = 50
    out_odd = jax.block_until_ready(
        mlp_forward(x[:n_odd], params, compute_dtype=jnp.float32))
    assert out_odd.shape == (n_odd, OUT_FEAT), out_odd.shape
    assert jnp.allclose(out_odd, ref[:n_odd], atol=1e-5, rtol=1e-5), \
        float(jnp.abs(out_odd - ref[:n_odd]).max())

    # --- production path: bf16 MXU operands, bf16 activations, bf16 output ---
    out_bf16 = jax.block_until_ready(mlp_forward(x, params, compute_dtype=jnp.bfloat16))
    ref_bf16 = mlp_reference_bf16(x, params)
    assert out_bf16.shape == (N, OUT_FEAT), out_bf16.shape
    assert out_bf16.dtype == jnp.bfloat16, out_bf16.dtype
    diff = jnp.abs(out_bf16.astype(jnp.float32) - ref_bf16.astype(jnp.float32))
    assert jnp.allclose(out_bf16.astype(jnp.float32), ref_bf16.astype(jnp.float32),
                        atol=5e-2, rtol=5e-2), float(diff.max())

    # TODO(synk): hidden_norm (LayerNorm/BatchNorm) branch not implemented; the
    # module instantiates it as None in this configuration.
    print("KERNEL_OK")
</pallas_src>

<mosaic_0001>
module attributes {stable_mosaic.version = 11 : i64} {
  func.func @kernel(%arg0: i32, %arg1: memref<64x16xf32, #tpu.memory_space<vmem>>, %arg2: memref<2x16x64xf32, #tpu.memory_space<vmem>>, %arg3: memref<5x64x64xf32, #tpu.memory_space<vmem>>, %arg4: memref<6x64xf32, #tpu.memory_space<vmem>>, %arg5: memref<64x128xf32, #tpu.memory_space<vmem>>, %arg6: memref<1x128xf32, #tpu.memory_space<vmem>>, %arg7: memref<64x128xf32, #tpu.memory_space<vmem>>) attributes {dimension_semantics = [#tpu.dimension_semantics<parallel>], iteration_bounds = array<i64: 2>, scalar_prefetch = 0 : i64, scratch_operands = 0 : i64, tpu.core_type = #tpu.core_type<tc>, window_params = [{transform_indices = @transform_0, window_bounds = array<i64: 64, 16>}, {pipeline_mode = #tpu.pipeline_mode<synchronous>, transform_indices = @transform_1, window_bounds = array<i64: 2, 16, 64>}, {pipeline_mode = #tpu.pipeline_mode<synchronous>, transform_indices = @transform_2, window_bounds = array<i64: 5, 64, 64>}, {pipeline_mode = #tpu.pipeline_mode<synchronous>, transform_indices = @transform_3, window_bounds = array<i64: 6, 64>}, {pipeline_mode = #tpu.pipeline_mode<synchronous>, transform_indices = @transform_4, window_bounds = array<i64: 64, 128>}, {pipeline_mode = #tpu.pipeline_mode<synchronous>, transform_indices = @transform_5, window_bounds = array<i64: 1, 128>}, {transform_indices = @transform_6, window_bounds = array<i64: 64, 128>}]} {
    %c0 = arith.constant 0 : index
    %c0_0 = arith.constant 0 : index
    %0 = vector.load %arg1[%c0, %c0_0] : memref<64x16xf32, #tpu.memory_space<vmem>>, vector<64x16xf32>
    %c0_1 = arith.constant 0 : index
    %c0_2 = arith.constant 0 : index
    %c0_3 = arith.constant 0 : index
    %1 = vector.load %arg2[%c0_1, %c0_2, %c0_3] : memref<2x16x64xf32, #tpu.memory_space<vmem>>, vector<1x16x64xf32>
    %2 = vector.shape_cast %1 : vector<1x16x64xf32> to vector<16x64xf32>
    %cst = arith.constant dense<0.000000e+00> : vector<64x64xf32>
    %3 = tpu.matmul %0, %2, %cst {dimension_numbers = #tpu.dot_dimension_numbers<[1], [0], [0], [1], [0, 0, 1, 1], [], []>} : vector<64x16xf32>, vector<16x64xf32>, vector<64x64xf32> -> vector<64x64xf32>
    %c0_4 = arith.constant 0 : index
    %c0_5 = arith.constant 0 : index
    %4 = vector.load %arg4[%c0_4, %c0_5] : memref<6x64xf32, #tpu.memory_space<vmem>>, vector<1x64xf32>
    %5 = vector.broadcast %4 : vector<1x64xf32> to vector<64x64xf32>
    %6 = arith.addf %3, %5 : vector<64x64xf32>
    %cst_6 = arith.constant 0.000000e+00 : f32
    %7 = vector.broadcast %cst_6 : f32 to vector<64x64xf32>
    %8 = arith.maximumf %6, %7 : vector<64x64xf32>
    %c0_7 = arith.constant 0 : index
    %c0_8 = arith.constant 0 : index
    %c0_9 = arith.constant 0 : index
    %9 = vector.load %arg3[%c0_7, %c0_8, %c0_9] : memref<5x64x64xf32, #tpu.memory_space<vmem>>, vector<1x64x64xf32>
    %10 = vector.shape_cast %9 : vector<1x64x64xf32> to vector<64x64xf32>
    %cst_10 = arith.constant dense<0.000000e+00> : vector<64x64xf32>
    %11 = tpu.matmul %8, %10, %cst_10 {dimension_numbers = #tpu.dot_dimension_numbers<[1], [0], [0], [1], [0, 0, 1, 1], [], []>} : vector<64x64xf32>, vector<64x64xf32>, vector<64x64xf32> -> vector<64x64xf32>
    %c1 = arith.constant 1 : index
    %c0_11 = arith.constant 0 : index
    %12 = vector.load %arg4[%c1, %c0_11] : memref<6x64xf32, #tpu.memory_space<vmem>>, vector<1x64xf32>
    %13 = vector.broadcast %12 : vector<1x64xf32> to vector<64x64xf32>
    %14 = arith.addf %11, %13 : vector<64x64xf32>
    %cst_12 = arith.constant 0.000000e+00 : f32
    %15 = vector.broadcast %cst_12 : f32 to vector<64x64xf32>
    %16 = arith.maximumf %14, %15 : vector<64x64xf32>
    %c1_13 = arith.constant 1 : index
    %c0_14 = arith.constant 0 : index
    %c0_15 = arith.constant 0 : index
    %17 = vector.load %arg3[%c1_13, %c0_14, %c0_15] : memref<5x64x64xf32, #tpu.memory_space<vmem>>, vector<1x64x64xf32>
    %18 = vector.shape_cast %17 : vector<1x64x64xf32> to vector<64x64xf32>
    %cst_16 = arith.constant dense<0.000000e+00> : vector<64x64xf32>
    %19 = tpu.matmul %16, %18, %cst_16 {dimension_numbers = #tpu.dot_dimension_numbers<[1], [0], [0], [1], [0, 0, 1, 1], [], []>} : vector<64x64xf32>, vector<64x64xf32>, vector<64x64xf32> -> vector<64x64xf32>
    %c2 = arith.constant 2 : index
    %c0_17 = arith.constant 0 : index
    %20 = vector.load %arg4[%c2, %c0_17] : memref<6x64xf32, #tpu.memory_space<vmem>>, vector<1x64xf32>
    %21 = vector.broadcast %20 : vector<1x64xf32> to vector<64x64xf32>
    %22 = arith.addf %19, %21 : vector<64x64xf32>
    %cst_18 = arith.constant 0.000000e+00 : f32
    %23 = vector.broadcast %cst_18 : f32 to vector<64x64xf32>
    %24 = arith.maximumf %22, %23 : vector<64x64xf32>
    %c2_19 = arith.constant 2 : index
    %c0_20 = arith.constant 0 : index
    %c0_21 = arith.constant 0 : index
    %25 = vector.load %arg3[%c2_19, %c0_20, %c0_21] : memref<5x64x64xf32, #tpu.memory_space<vmem>>, vector<1x64x64xf32>
    %26 = vector.shape_cast %25 : vector<1x64x64xf32> to vector<64x64xf32>
    %cst_22 = arith.constant dense<0.000000e+00> : vector<64x64xf32>
    %27 = tpu.matmul %24, %26, %cst_22 {dimension_numbers = #tpu.dot_dimension_numbers<[1], [0], [0], [1], [0, 0, 1, 1], [], []>} : vector<64x64xf32>, vector<64x64xf32>, vector<64x64xf32> -> vector<64x64xf32>
    %c3 = arith.constant 3 : index
    %c0_23 = arith.constant 0 : index
    %28 = vector.load %arg4[%c3, %c0_23] : memref<6x64xf32, #tpu.memory_space<vmem>>, vector<1x64xf32>
    %29 = vector.broadcast %28 : vector<1x64xf32> to vector<64x64xf32>
    %30 = arith.addf %27, %29 : vector<64x64xf32>
    %cst_24 = arith.constant 0.000000e+00 : f32
    %31 = vector.broadcast %cst_24 : f32 to vector<64x64xf32>
    %32 = arith.maximumf %30, %31 : vector<64x64xf32>
    %c3_25 = arith.constant 3 : index
    %c0_26 = arith.constant 0 : index
    %c0_27 = arith.constant 0 : index
    %33 = vector.load %arg3[%c3_25, %c0_26, %c0_27] : memref<5x64x64xf32, #tpu.memory_space<vmem>>, vector<1x64x64xf32>
    %34 = vector.shape_cast %33 : vector<1x64x64xf32> to vector<64x64xf32>
    %cst_28 = arith.constant dense<0.000000e+00> : vector<64x64xf32>
    %35 = tpu.matmul %32, %34, %cst_28 {dimension_numbers = #tpu.dot_dimension_numbers<[1], [0], [0], [1], [0, 0, 1, 1], [], []>} : vector<64x64xf32>, vector<64x64xf32>, vector<64x64xf32> -> vector<64x64xf32>
    %c1_29 = arith.constant 1 : index
    %c0_30 = arith.constant 0 : index
    %c0_31 = arith.constant 0 : index
    %36 = vector.load %arg2[%c1_29, %c0_30, %c0_31] : memref<2x16x64xf32, #tpu.memory_space<vmem>>, vector<1x16x64xf32>
    %37 = vector.shape_cast %36 : vector<1x16x64xf32> to vector<16x64xf32>
    %cst_32 = arith.constant dense<0.000000e+00> : vector<64x64xf32>
    %38 = tpu.matmul %0, %37, %cst_32 {dimension_numbers = #tpu.dot_dimension_numbers<[1], [0], [0], [1], [0, 0, 1, 1], [], []>} : vector<64x16xf32>, vector<16x64xf32>, vector<64x64xf32> -> vector<64x64xf32>
    %39 = arith.addf %35, %38 : vector<64x64xf32>
    %c4 = arith.constant 4 : index
    %c0_33 = arith.constant 0 : index
    %40 = vector.load %arg4[%c4, %c0_33] : memref<6x64xf32, #tpu.memory_space<vmem>>, vector<1x64xf32>
    %41 = vector.broadcast %40 : vector<1x64xf32> to vector<64x64xf32>
    %42 = arith.addf %39, %41 : vector<64x64xf32>
    %cst_34 = arith.constant 0.000000e+00 : f32
    %43 = vector.broadcast %cst_34 : f32 to vector<64x64xf32>
    %44 = arith.maximumf %42, %43 : vector<64x64xf32>
    %c4_35 = arith.constant 4 : index
    %c0_36 = arith.constant 0 : index
    %c0_37 = arith.constant 0 : index
    %45 = vector.load %arg3[%c4_35, %c0_36, %c0_37] : memref<5x64x64xf32, #tpu.memory_space<vmem>>, vector<1x64x64xf32>
    %46 = vector.shape_cast %45 : vector<1x64x64xf32> to vector<64x64xf32>
    %cst_38 = arith.constant dense<0.000000e+00> : vector<64x64xf32>
    %47 = tpu.matmul %44, %46, %cst_38 {dimension_numbers = #tpu.dot_dimension_numbers<[1], [0], [0], [1], [0, 0, 1, 1], [], []>} : vector<64x64xf32>, vector<64x64xf32>, vector<64x64xf32> -> vector<64x64xf32>
    %c5 = arith.constant 5 : index
    %c0_39 = arith.constant 0 : index
    %48 = vector.load %arg4[%c5, %c0_39] : memref<6x64xf32, #tpu.memory_space<vmem>>, vector<1x64xf32>
    %49 = vector.broadcast %48 : vector<1x64xf32> to vector<64x64xf32>
    %50 = arith.addf %47, %49 : vector<64x64xf32>
    %cst_40 = arith.constant 0.000000e+00 : f32
    %51 = vector.broadcast %cst_40 : f32 to vector<64x64xf32>
    %52 = arith.maximumf %50, %51 : vector<64x64xf32>
    %c0_41 = arith.constant 0 : index
    %c0_42 = arith.constant 0 : index
    %53 = vector.load %arg5[%c0_41, %c0_42] : memref<64x128xf32, #tpu.memory_space<vmem>>, vector<64x128xf32>
    %cst_43 = arith.constant dense<0.000000e+00> : vector<64x128xf32>
    %54 = tpu.matmul %52, %53, %cst_43 {dimension_numbers = #tpu.dot_dimension_numbers<[1], [0], [0], [1], [0, 0, 1, 1], [], []>} : vector<64x64xf32>, vector<64x128xf32>, vector<64x128xf32> -> vector<64x128xf32>
    %c0_44 = arith.constant 0 : index
    %c0_45 = arith.constant 0 : index
    %55 = vector.load %arg6[%c0_44, %c0_45] : memref<1x128xf32, #tpu.memory_space<vmem>>, vector<1x128xf32>
    %56 = vector.broadcast %55 : vector<1x128xf32> to vector<64x128xf32>
    %57 = arith.addf %54, %56 : vector<64x128xf32>
    %cst_46 = arith.constant 0.000000e+00 : f32
    %58 = vector.broadcast %cst_46 : f32 to vector<64x128xf32>
    %59 = arith.maximumf %57, %58 : vector<64x128xf32>
    %c0_47 = arith.constant 0 : index
    %c0_48 = arith.constant 0 : index
    %60 = vector.load %arg7[%c0_47, %c0_48] : memref<64x128xf32, #tpu.memory_space<vmem>>, vector<64x128xf32>
    tpu.vector_store %arg7[%c0_47, %c0_48], %59 {strides = array<i32>} : memref<64x128xf32, #tpu.memory_space<vmem>>, vector<64x128xf32>,
    return
  }
  func.func @transform_0(%arg0: i32) -> (i32, i32) {
    %c0_i32 = arith.constant 0 : i32
    %c0_i32_0 = arith.constant 0 : i32
    return %arg0, %c0_i32 : i32, i32
  }
  func.func @transform_1(%arg0: i32) -> (i32, i32, i32) {
    %c0_i32 = arith.constant 0 : i32
    %c0_i32_0 = arith.constant 0 : i32
    %c0_i32_1 = arith.constant 0 : i32
    %c0_i32_2 = arith.constant 0 : i32
    return %c0_i32, %c0_i32_0, %c0_i32_1 : i32, i32, i32
  }
  func.func @transform_2(%arg0: i32) -> (i32, i32, i32) {
    %c0_i32 = arith.constant 0 : i32
    %c0_i32_0 = arith.constant 0 : i32
    %c0_i32_1 = arith.constant 0 : i32
    %c0_i32_2 = arith.constant 0 : i32
    return %c0_i32, %c0_i32_0, %c0_i32_1 : i32, i32, i32
  }
  func.func @transform_3(%arg0: i32) -> (i32, i32) {
    %c0_i32 = arith.constant 0 : i32
    %c0_i32_0 = arith.constant 0 : i32
    %c0_i32_1 = arith.constant 0 : i32
    return %c0_i32, %c0_i32_0 : i32, i32
  }
  func.func @transform_4(%arg0: i32) -> (i32, i32) {
    %c0_i32 = arith.constant 0 : i32
    %c0_i32_0 = arith.constant 0 : i32
    %c0_i32_1 = arith.constant 0 : i32
    return %c0_i32, %c0_i32_0 : i32, i32
  }
  func.func @transform_5(%arg0: i32) -> (i32, i32) {
    %c0_i32 = arith.constant 0 : i32
    %c0_i32_0 = arith.constant 0 : i32
    %c0_i32_1 = arith.constant 0 : i32
    return %c0_i32, %c0_i32_0 : i32, i32
  }
  func.func @transform_6(%arg0: i32) -> (i32, i32) {
    %c0_i32 = arith.constant 0 : i32
    %c0_i32_0 = arith.constant 0 : i32
    return %arg0, %c0_i32 : i32, i32
  }
}

</mosaic_0001>

<bundles_post_ra>
// kernel: tpu_custom_call.1
= control target key start
LH: loop header
LB: loop body
LE: loop exit
PB: predicated region body
PF: predicated region fallthrough
CT: control target
= control target key end

     0   :  { %11 = vsyncpa [#allocation3], 0  ;;  %s1553_s0 = inlined_call_operand.vmem [shape: f32[128,16], index: 0, kind: input, shape index: {}]   ;;  %s1554_s1 = inlined_call_operand.vmem [shape: f32[2,16,64], index: 1, kind: input, shape index: {}]   ;;  %s1555_s2 = inlined_call_operand.hbm [shape: f32[5,64,64], index: 2, kind: input, shape index: {}]   ;;  %s1556_s3 = inlined_call_operand.vmem [shape: f32[6,64], index: 3, kind: input, shape index: {}]   ;;  %s1557_s4 = inlined_call_operand.vmem [shape: f32[64,128], index: 4, kind: input, shape index: {}]   ;;  %s1558_s5 = inlined_call_operand.vmem [shape: f32[1,128], index: 5, kind: input, shape index: {}]   ;;  %s1559_s6 = inlined_call_operand.hbm [shape: f32[128,128], index: 6, kind: output, shape index: {}]  }
   0x1   :  { %12 = vsyncpa [#allocation4], 0 }
   0x2   :  { %14 = vsyncpa [#allocation4 + $0x1], 0  ;;  %s1291_s21 = smov 0   ;;  %s1293_s22 = smov 0  }
   0x3   :  { %s1295_s23 = smov 0   ;;  %s1297_s24 = smov 0  }
   0x4 LB: > { %s1312_s25 = sadd.s32 4294967295, %s1249_s24   ;;  %s1011_s26 = sadd.s32 4294967294, %s1249_s24   ;;  %s1249_s24 = sphi %s1297_s24, %s1565_s24   ;;  %s1245_s23 = sphi %s1295_s23, %s1564_s23   ;;  %s1241_s22 = sphi %s1293_s22, %s1563_s22   ;;  %s1237_s21 = sphi %s1291_s21, %s1562_s21  }
   0x5   : > { %s1316_s27 = sadd.s32 1, %s1249_s24   ;;  %s158_s28 = sadd.s32 1, %s1245_s23 }
   0x6   : > { %s155_s29 = ssub.s32 %s1249_s24, %s1316_s27  ;;  %p168_p0 = scmp.ne.s32.totalorder %s1245_s23, %s1241_s22 }
   0x7   : > { %p156_p1 = scmp.eq.s32.totalorder %s155_s29, 0  ;;  %p169_p2 = scmp.eq.s32.totalorder %s1312_s25, 1 }
   0x8   : > { %p174_p3 = scmp.ne.s32.totalorder %s1241_s22, %s1237_s21  ;;  %p175_p4 = scmp.eq.s32.totalorder %s1011_s26, 1 }
   0x9   : > { %s1327_s30 = scalar_select %p156_p1, %s1245_s23, %s158_s28  }
   0xa   : > { %p1329_p5 = por %p169_p2, %p168_p0  ;;  %p1333_p6 = por %p175_p4, %p174_p3 }
   0xb   : > { %p1012_p7 = scmp.ge.s32.totalorder %s1249_s24, 1  ;;  %p182_p8 = scmp.lt.s32.totalorder %s1249_s24, 3 }
   0xc   : > { %p1106_p9 = scmp.eq.s32.totalorder %s1312_s25, 0  ;;  %s196_s11 = sshll.u32 %s1555_s2, 4  ;;  %s197_s11 = int_to_ptr.hbm [resolvable:$true] %s196_s11 }
   0xd   : > { %p183_p10 = pnand %p1012_p7, %p182_p8  ;;  %s1251_s12 = smov [#allocation2]  }
   0xe   : > { %s198_s13 = sshll.u32 %s1251_s12, 4  ;;  %s1252_s14 = smov 128   ;;  %s199_s13 = int_to_ptr.vmem [resolvable:$true] %s198_s13 }
   0xf   : > { %p1098_p11 = pneg %p183_p10  ;;  %s1253_s15 = smov 8  }
  0x10   : > { %232 = sbr.rel (%p183_p10) target bundleno = 1025 (0x401), region = 44 }
  0x11   : > { %p1099_p12 = pnand %p1106_p9, %p1098_p11 }
  0x13   : > { %1101 = dma.hbm_to_vmem [thread:$0]  (!%p1099_p12), %s197_s11, 5120, %s199_s13, [#allocation3], %s1252_s14, %s1252_s14, %s1253_s15  }
  0x15   : > { %1228 = dma.done.wait (%p1106_p9), [#allocation3], 5120  }
  0x16   : > { %1230 = vsyncadd (%p1106_p9), [#allocation3], 4294962176  ;;  %s1018_s16 = sshll.u32 %s1312_s25, 3  ;;  %v279_v0 = vld [vmem:[%s1554_s1 + $0x8] sm:$0xff]  ;;  %v278_v1 = vld [vmem:[%s1554_s1] sm:$0xff]  ;;  %vm282_vm0 = vcmask 130048  }
  0x17   : > { %p264_p13 = scmp.lt.s32.totalorder %s1018_s16, 15  ;;  %321 = vmatpush.msra.mxu0 %v279_v0  ;;  %v363_v6 = vld [vmem:[#allocation2 + $0x38] sm:$0xff]  ;;  %v362_v7 = vld [vmem:[#allocation2 + $0x30] sm:$0xff]  ;;  %v361_v8 = vld [vmem:[#allocation2 + $0x28] sm:$0xff]  ;;  %vm366_vm1 = vcmask 523264   ;;  %s260_s12 = sand.u32 1, %s1241_s22  }
  0x18   : > { %399 = vmatpush.msra.mxu1 %v363_v6  ;;  %v360_v9 = vld [vmem:[#allocation2 + $0x20] sm:$0xff]  ;;  %v359_v11 = vld [vmem:[#allocation2 + $0x18] sm:$0xff]  ;;  %v358_v15 = vld [vmem:[#allocation2 + $0x10] sm:$0xff]  ;;  %s1017_s15 = sshll.u32 %s260_s12, 6  ;;  %s922_s29 = scalar_lea.sflag [#allocation4], %s260_s12 }
  0x19   : > { %s1567_s16 = smov (!%p264_p13, %s1018_s16), 15  ;;  %322 = vmatpush.msra.mxu0 %v278_v1  ;;  %v357_v16 = vld [vmem:[#allocation2 + $0x8] sm:$0xff]  ;;  %v356_v17 = vld [vmem:[#allocation2] sm:$0xff]  ;;  %v448_v31 = vld [vmem:[#allocation2 + $0x78] sm:$0xff]  ;;  %s1203_s13 = scalar_lea.hbm %s1559_s6, 128 }
  0x1a   : > { %s1019_s17 = sshll.u32 %s1567_s16, 3  ;;  %400 = vmatpush.msra.mxu1 %v362_v7  ;;  %v1146_v18 = vld [vmem:[%s1556_s3] ss:$0 sm:$0xff]  ;;  %v447_v32 = vld [vmem:[#allocation2 + $0x70] sm:$0xff]  ;;  %483 = vmatpush.msra.mxu2 %v448_v31  ;;  %v446_v33 = vld [vmem:[#allocation2 + $0x68] sm:$0xff]  ;;  %s1509_s16 = scalar_lea.vmem [#allocation5], %s1017_s15 }
  0x1b   : > { %s267_s20 = scalar_lea.vmem %s1553_s0, %s1019_s17  ;;  %v445_v36 = vld [vmem:[#allocation2 + $0x60] sm:$0xff]  ;;  %v444_v38 = vld [vmem:[#allocation2 + $0x58] sm:$0xff]  ;;  %v443_v48 = vld [vmem:[#allocation2 + $0x50] sm:$0xff]  ;;  %s1091_s17 = sshll.u32 %s1312_s25, 6 }
  0x1c   : > { %v1359_v2 = vld [vmem:[%s267_s20] sm:$0xff]  ;;  %v1363_v3 = vld [vmem:[%s267_s20 + $0x8] sm:$0xff]  ;;  %v1367_v4 = vld [vmem:[%s267_s20 + $0x10] sm:$0xff]  ;;  %401 = vmatpush.msra.mxu1 %v361_v8  ;;  %484 = vmatpush.msra.mxu2 %v447_v32  ;;  %s934_s26 = sshll.u32 %s1509_s16, 4  ;;  %s935_s26 = int_to_ptr.vmem [resolvable:$true] %s934_s26 }
  0x1d   : > { %1020 = vmatmul.msk.f32.vlgmr.msra.gmra.mxu0 %vm282_vm0, %v1359_v2  ;;  %v1371_v5 = vld [vmem:[%s267_s20 + $0x18] sm:$0xff]  ;;  %v1375_v10 = vld [vmem:[%s267_s20 + $0x20] sm:$0xff]  ;;  %v1379_v12 = vld [vmem:[%s267_s20 + $0x28] sm:$0xff] }
  0x1e   : > { %402 = vmatpush.msra.mxu1 %v360_v9  ;;  %v1383_v13 = vld [vmem:[%s267_s20 + $0x30] sm:$0xff]  ;;  %v1387_v14 = vld [vmem:[%s267_s20 + $0x38] sm:$0xff]  ;;  %485 = vmatpush.msra.mxu2 %v446_v33  ;;  %v442_v49 = vld [vmem:[#allocation2 + $0x48] sm:$0xff]  ;;  %s933_s20 = scalar_lea.hbm %s1559_s6, %s1091_s17 }
  0x1f   : > { %v441_v50 = vld [vmem:[#allocation2 + $0x40] sm:$0xff]  ;;  %v532_v0 = vld [vmem:[#allocation2 + $0xb8] sm:$0xff]  ;;  %v531_v1 = vld [vmem:[#allocation2 + $0xb0] sm:$0xff]  ;;  %s936_s28 = sshll.u32 %s933_s20, 4  ;;  %s937_s28 = int_to_ptr.hbm [resolvable:$true] %s936_s28 }
  0x20   : > { %403 = vmatpush.msra.mxu1 %v359_v11  ;;  %486 = vmatpush.msra.mxu2 %v445_v36  ;;  %v1147_v51 = vld [vmem:[%s1556_s3 + $0x1] ss:$0 sm:$0xff]  ;;  %v530_v6 = vld [vmem:[#allocation2 + $0xa8] sm:$0xff]  ;;  %s1197_s9 = sshra.s32 %s937_s28, 4  ;;  %s1198_s9 = int_to_ptr.hbm [resolvable:$true] %s1197_s9 }
  0x21   : > { %567 = vmatpush.msra.mxu3 %v532_v0  ;;  %v529_v9 = vld [vmem:[#allocation2 + $0xa0] sm:$0xff]  ;;  %s1199_s25 = scalar_lea.hbm %s1198_s9, 64  ;;  %p1204_p3 = scmp.lt.s32.totalorder %s1198_s9, %s1559_s6 }
  0x22   : > { %404 = vmatpush.msra.mxu1 %v358_v15  ;;  %487 = vmatpush.msra.mxu2 %v444_v38  ;;  %v528_v15 = vld [vmem:[#allocation2 + $0x98] sm:$0xff]  ;;  %p1200_p0 = scmp.ne.s32.totalorder %s1198_s9, %s1199_s25  ;;  %p1205_p4 = scmp.lt.s32.totalorder %s1203_s13, %s1199_s25 }
  0x23   : > { %568 = vmatpush.msra.mxu3 %v531_v1 }
  0x24   : > { %405 = vmatpush.msra.mxu1 %v357_v16  ;;  %488 = vmatpush.msra.mxu2 %v443_v48  ;;  %v613_v48 = vld [vmem:[#allocation2 + $0xe0] sm:$0xff]  ;;  %p1201_p1 = pnand %p1200_p0, %p1329_p5  ;;  %p1206_p7 = por %p1205_p4, %p1204_p3 }
  0x25   : > { %1021 = vmatmul.msk.f32.gmra.mxu0 %vm282_vm0, %v1363_v3  ;;  %569 = vmatpush.msra.mxu3 %v530_v6 }
  0x26   : > { %406 = vmatpush.msra.mxu1 %v356_v17  ;;  %489 = vmatpush.msra.mxu2 %v442_v49  ;;  %p1202_p2 = pneg %p1201_p1 }
  0x27   : > { %570 = vmatpush.msra.mxu3 %v529_v9  ;;  %v751_v9 = vld [vmem:[#allocation2 + $0x130] sm:$0xff] }
  0x28   : > { %490 = vmatpush.msra.mxu2 %v441_v50  ;;  %v612_v50 = vld [vmem:[#allocation2 + $0xd8] sm:$0xff]  ;;  %p1207_p8 = pnand %p1206_p7, %p1202_p2 }
  0x29   : > { %571 = vmatpush.msra.mxu3 %v528_v15 }
  0x2d   : > { %1022 = vmatmul.msk.f32.gmra.mxu0 %vm282_vm0, %v1367_v4 }
  0x35   : > { %1023 = vmatmul.msk.f32.gmra.mxu0 %vm282_vm0, %v1371_v5 }
  0x3d   : > { %1024 = vmatmul.msk.f32.gmra.mxu0 %vm282_vm0, %v1375_v10 }
  0x45   : > { %1025 = vmatmul.msk.f32.gmra.mxu0 %vm282_vm0, %v1379_v12 }
  0x4d   : > { %1026 = vmatmul.msk.f32.gmra.mxu0 %vm282_vm0, %v1383_v13 }
  0x55   : > { %1027 = vmatmul.msk.f32.gmra.mxu0 %vm282_vm0, %v1387_v14 }
  0x9a   : > { %v324_v19 = vpop.f32.mrf.mxu0 }
  0x9b   : > { %v325_v20 = vadd.f32 %v1146_v18, %v324_v19 }
  0x9d   : > { %v348_v21 = vmax.f32 %v325_v20, 0.0 }
  0x9f   : > { %1028 = vmatmul.msk.f32.vlgmr.msra.gmra.mxu1 %vm366_vm1, %v348_v21 }
  0xa2   : > { %v327_v22 = vpop.f32.mrf.mxu0 }
  0xa3   : > { %v328_v23 = vadd.f32 %v1146_v18, %v327_v22 }
  0xa5   : > { %v349_v24 = vmax.f32 %v328_v23, 0.0 }
  0xa7   : > { %1029 = vmatmul.msk.f32.gmra.mxu1 %vm366_vm1, %v349_v24 }
  0xaa   : > { %v330_v25 = vpop.f32.mrf.mxu0 }
  0xab   : > { %v331_v26 = vadd.f32 %v1146_v18, %v330_v25  ;;  %v527_v25 = vld [vmem:[#allocation2 + $0x90] sm:$0xff] }
  0xac   : > { %572 = vmatpush.msra.mxu3 %v527_v25 }
  0xad   : > { %v350_v27 = vmax.f32 %v331_v26, 0.0  ;;  %v526_v26 = vld [vmem:[#allocation2 + $0x88] sm:$0xff] }
  0xae   : > { %573 = vmatpush.msra.mxu3 %v526_v26 }
  0xaf   : > { %1030 = vmatmul.msk.f32.gmra.mxu1 %vm366_vm1, %v350_v27  ;;  %v525_v27 = vld [vmem:[#allocation2 + $0x80] sm:$0xff] }
  0xb0   : > { %574 = vmatpush.msra.mxu3 %v525_v27 }
  0xb2   : > { %v333_v28 = vpop.f32.mrf.mxu0 }
  0xb3   : > { %v334_v29 = vadd.f32 %v1146_v18, %v333_v28  ;;  %v1148_v28 = vld [vmem:[%s1556_s3 + $0x2] ss:$0 sm:$0xff] }
  0xb5   : > { %v351_v30 = vmax.f32 %v334_v29, 0.0 }
  0xb7   : > { %1031 = vmatmul.msk.f32.gmra.mxu1 %vm366_vm1, %v351_v30 }
  0xba   : > { %v336_v34 = vpop.f32.mrf.mxu0 }
  0xbb   : > { %v337_v35 = vadd.f32 %v1146_v18, %v336_v34 }
  0xbd   : > { %v352_v37 = vmax.f32 %v337_v35, 0.0 }
  0xbf   : > { %1032 = vmatmul.msk.f32.gmra.mxu1 %vm366_vm1, %v352_v37 }
  0xc2   : > { %v339_v39 = vpop.f32.mrf.mxu0 }
  0xc3   : > { %v340_v40 = vadd.f32 %v1146_v18, %v339_v39 }
  0xc5   : > { %v353_v41 = vmax.f32 %v340_v40, 0.0 }
  0xc7   : > { %1033 = vmatmul.msk.f32.gmra.mxu1 %vm366_vm1, %v353_v41  ;;  %v1053_v41 = vld [vmem:[%s1554_s1 + $0x18] sm:$0xff] }
  0xc8   : > { %634 = vmatpush.msrb.mxu0 %v1053_v41 }
  0xca   : > { %v342_v42 = vpop.f32.mrf.mxu0 }
  0xcb   : > { %v343_v43 = vadd.f32 %v1146_v18, %v342_v42  ;;  %v616_v42 = vld [vmem:[#allocation2 + $0xf8] sm:$0xff] }
  0xcc   : > { %693 = vmatpush.msrb.mxu1 %v616_v42 }
  0xcd   : > { %v354_v44 = vmax.f32 %v343_v43, 0.0  ;;  %v615_v43 = vld [vmem:[#allocation2 + $0xf0] sm:$0xff] }
  0xce   : > { %694 = vmatpush.msrb.mxu1 %v615_v43 }
  0xcf   : > { %1034 = vmatmul.msk.f32.gmra.mxu1 %vm366_vm1, %v354_v44  ;;  %v1052_v44 = vld [vmem:[%s1554_s1 + $0x10] sm:$0xff] }
  0xd0   : > { %635 = vmatpush.msrb.mxu0 %v1052_v44 }
  0xd1   : > { %1054 = vmatmul.msk.f32.vlgmr.msrb.gmra.mxu0 %vm282_vm0, %v1359_v2 }
  0xd2   : > { %v345_v45 = vpop.f32.mrf.mxu0 }
  0xd3   : > { %v346_v46 = vadd.f32 %v1146_v18, %v345_v45  ;;  %v614_v45 = vld [vmem:[#allocation2 + $0xe8] sm:$0xff] }
  0xd4   : > { %695 = vmatpush.msrb.mxu1 %v614_v45 }
  0xd5   : > { %v355_v47 = vmax.f32 %v346_v46, 0.0 }
  0xd6   : > { %696 = vmatpush.msrb.mxu1 %v613_v48 }
  0xd7   : > { %1035 = vmatmul.msk.f32.gmra.mxu1 %vm366_vm1, %v355_v47 }
  0xd8   : > { %697 = vmatpush.msrb.mxu1 %v612_v50 }
  0xd9   : > { %1055 = vmatmul.msk.f32.gmra.mxu0 %vm282_vm0, %v1363_v3  ;;  %v1149_v3 = vld [vmem:[%s1556_s3 + $0x3] ss:$0 sm:$0xff] }
  0xe1   : > { %1056 = vmatmul.msk.f32.gmra.mxu0 %vm282_vm0, %v1367_v4 }
  0xe9   : > { %1057 = vmatmul.msk.f32.gmra.mxu0 %vm282_vm0, %v1371_v5 }
  0xf1   : > { %1058 = vmatmul.msk.f32.gmra.mxu0 %vm282_vm0, %v1375_v10 }
  0xf9   : > { %1059 = vmatmul.msk.f32.gmra.mxu0 %vm282_vm0, %v1379_v12 }
 0x101   : > { %1060 = vmatmul.msk.f32.gmra.mxu0 %vm282_vm0, %v1383_v13 }
 0x109   : > { %1061 = vmatmul.msk.f32.gmra.mxu0 %vm282_vm0, %v1387_v14 }
 0x11c   : > { %v408_v52 = vpop.f32.mrf.mxu1 }
 0x11d   : > { %v409_v53 = vadd.f32 %v1147_v51, %v408_v52  ;;  %v610_v52 = vld [vmem:[#allocation2 + $0xc8] sm:$0xff] }
 0x11f   : > { %v432_v54 = vmax.f32 %v409_v53, 0.0 }
 0x121   : > { %1036 = vmatmul.msk.f32.vlgmr.msra.gmra.mxu2 %vm366_vm1, %v432_v54 }
 0x124   : > { %v411_v55 = vpop.f32.mrf.mxu1 }
 0x125   : > { %v412_v56 = vadd.f32 %v1147_v51, %v411_v55  ;;  %v609_v55 = vld [vmem:[#allocation2 + $0xc0] sm:$0xff] }
 0x127   : > { %v433_v57 = vmax.f32 %v412_v56, 0.0 }
 0x129   : > { %1037 = vmatmul.msk.f32.gmra.mxu2 %vm366_vm1, %v433_v57 }
 0x12c   : > { %v414_v58 = vpop.f32.mrf.mxu1 }
 0x12d   : > { %v415_v59 = vadd.f32 %v1147_v51, %v414_v58 }
 0x12f   : > { %v434_v60 = vmax.f32 %v415_v59, 0.0 }
 0x131   : > { %1038 = vmatmul.msk.f32.gmra.mxu2 %vm366_vm1, %v434_v60 }
 0x134   : > { %v417_v61 = vpop.f32.mrf.mxu1 }
 0x135   : > { %v418_v62 = vadd.f32 %v1147_v51, %v417_v61 }
 0x137   : > { %v435_v63 = vmax.f32 %v418_v62, 0.0 }
 0x139   : > { %1039 = vmatmul.msk.f32.gmra.mxu2 %vm366_vm1, %v435_v63 }
 0x13c   : > { %v420_v7 = vpop.f32.mrf.mxu1 }
 0x13d   : > { %v421_v8 = vadd.f32 %v1147_v51, %v420_v7 }
 0x13f   : > { %v436_v11 = vmax.f32 %v421_v8, 0.0  ;;  %v752_v8 = vld [vmem:[#allocation2 + $0x138] sm:$0xff] }
 0x140   : > { %787 = vmatpush.msrb.mxu2 %v752_v8 }
 0x141   : > { %1040 = vmatmul.msk.f32.gmra.mxu2 %vm366_vm1, %v436_v11  ;;  %v750_v11 = vld [vmem:[#allocation2 + $0x128] sm:$0xff] }
 0x142   : > { %788 = vmatpush.msrb.mxu2 %v751_v9 }
 0x144   : > { %v423_v16 = vpop.f32.mrf.mxu1  ;;  %789 = vmatpush.msrb.mxu2 %v750_v11 }
 0x145   : > { %v424_v17 = vadd.f32 %v1147_v51, %v423_v16 }
 0x147   : > { %v437_v18 = vmax.f32 %v424_v17, 0.0  ;;  %v749_v17 = vld [vmem:[#allocation2 + $0x120] sm:$0xff] }
 0x148   : > { %790 = vmatpush.msrb.mxu2 %v749_v17  ;;  %v1151_v17 = vld [vmem:[%s1556_s3 + $0x5] ss:$0 sm:$0xff] }
 0x149   : > { %1041 = vmatmul.msk.f32.gmra.mxu2 %vm366_vm1, %v437_v18 }
 0x14c   : > { %v426_v19 = vpop.f32.mrf.mxu1 }
 0x14d   : > { %v427_v20 = vadd.f32 %v1147_v51, %v426_v19  ;;  %v748_v19 = vld [vmem:[#allocation2 + $0x118] sm:$0xff] }
 0x14e   : > { %791 = vmatpush.msrb.mxu2 %v748_v19 }
 0x14f   : > { %v438_v21 = vmax.f32 %v427_v20, 0.0  ;;  %v747_v20 = vld [vmem:[#allocation2 + $0x110] sm:$0xff] }
 0x150   : > { %792 = vmatpush.msrb.mxu2 %v747_v20 }
 0x151   : > { %1042 = vmatmul.msk.f32.gmra.mxu2 %vm366_vm1, %v438_v21  ;;  %v746_v21 = vld [vmem:[#allocation2 + $0x108] sm:$0xff] }
 0x152   : > { %793 = vmatpush.msrb.mxu2 %v746_v21 }
 0x154   : > { %v429_v22 = vpop.f32.mrf.mxu1 }
 0x155   : > { %v430_v23 = vadd.f32 %v1147_v51, %v429_v22  ;;  %v611_v51 = vld [vmem:[#allocation2 + $0xd0] sm:$0xff] }
 0x156   : > { %698 = vmatpush.msrb.mxu1 %v611_v51 }
 0x157   : > { %v439_v24 = vmax.f32 %v430_v23, 0.0 }
 0x158   : > { %699 = vmatpush.msrb.mxu1 %v610_v52 }
 0x159   : > { %1043 = vmatmul.msk.f32.gmra.mxu2 %vm366_vm1, %v439_v24  ;;  %v745_v24 = vld [vmem:[#allocation2 + $0x100] sm:$0xff] }
 0x15a   : > { %700 = vmatpush.msrb.mxu1 %v609_v55  ;;  %794 = vmatpush.msrb.mxu2 %v745_v24  ;;  %v834_v55 = vld [vmem:[%s1557_s4 + $0x30] sm:$0xff] }
 0x1a4   : > { %v492_v29 = vpop.f32.mrf.mxu2 }
 0x1a5   : > { %v493_v30 = vadd.f32 %v1148_v28, %v492_v29 }
 0x1a7   : > { %v516_v31 = vmax.f32 %v493_v30, 0.0 }
 0x1a9   : > { %1044 = vmatmul.msk.f32.vlgmr.msra.gmra.mxu3 %vm366_vm1, %v516_v31 }
 0x1ac   : > { %v495_v32 = vpop.f32.mrf.mxu2 }
 0x1ad   : > { %v496_v33 = vadd.f32 %v1148_v28, %v495_v32  ;;  %v637_v32 = vpop.f32.mrf.mxu0 }
 0x1af   : > { %v517_v34 = vmax.f32 %v496_v33, 0.0 }
 0x1b1   : > { %1045 = vmatmul.msk.f32.gmra.mxu3 %vm366_vm1, %v517_v34  ;;  %v1150_v34 = vld [vmem:[%s1556_s3 + $0x4] ss:$0 sm:$0xff] }
 0x1b4   : > { %v498_v35 = vpop.f32.mrf.mxu2 }
 0x1b5   : > { %v499_v36 = vadd.f32 %v1148_v28, %v498_v35  ;;  %v640_v33 = vpop.f32.mrf.mxu0 }
 0x1b7   : > { %v518_v37 = vmax.f32 %v499_v36, 0.0 }
 0x1b9   : > { %1046 = vmatmul.msk.f32.gmra.mxu3 %vm366_vm1, %v518_v37 }
 0x1bc   : > { %v501_v38 = vpop.f32.mrf.mxu2 }
 0x1bd   : > { %v502_v39 = vadd.f32 %v1148_v28, %v501_v38  ;;  %v643_v38 = vpop.f32.mrf.mxu0 }
 0x1bf   : > { %v519_v40 = vmax.f32 %v502_v39, 0.0 }
 0x1c1   : > { %1047 = vmatmul.msk.f32.gmra.mxu3 %vm366_vm1, %v519_v40 }
 0x1c4   : > { %v504_v46 = vpop.f32.mrf.mxu2 }
 0x1c5   : > { %v505_v47 = vadd.f32 %v1148_v28, %v504_v46  ;;  %v646_v44 = vpop.f32.mrf.mxu0 }
 0x1c7   : > { %v520_v49 = vmax.f32 %v505_v47, 0.0 }
 0x1c9   : > { %1048 = vmatmul.msk.f32.gmra.mxu3 %vm366_vm1, %v520_v49 }
 0x1cc   : > { %v507_v53 = vpop.f32.mrf.mxu2 }
 0x1cd   : > { %v508_v54 = vadd.f32 %v1148_v28, %v507_v53  ;;  %v649_v50 = vpop.f32.mrf.mxu0 }
 0x1cf   : > { %v521_v56 = vmax.f32 %v508_v54, 0.0  ;;  %v835_v54 = vld [vmem:[%s1557_s4 + $0x38] sm:$0xff] }
 0x1d0   : > { %872 = vmatpush.msrb.mxu3 %v835_v54 }
 0x1d1   : > { %1049 = vmatmul.msk.f32.gmra.mxu3 %vm366_vm1, %v521_v56 }
 0x1d2   : > { %873 = vmatpush.msrb.mxu3 %v834_v55 }
 0x1d4   : > { %v510_v2 = vpop.f32.mrf.mxu2 }
 0x1d5   : > { %v511_v57 = vadd.f32 %v1148_v28, %v510_v2 }
 0x1d7   : > { %v522_v58 = vmax.f32 %v511_v57, 0.0  ;;  %v833_v57 = vld [vmem:[%s1557_s4 + $0x28] sm:$0xff] }
 0x1d8   : > { %874 = vmatpush.msrb.mxu3 %v833_v57 }
 0x1d9   : > { %1050 = vmatmul.msk.f32.gmra.mxu3 %vm366_vm1, %v522_v58  ;;  %v652_v58 = vpop.f32.mrf.mxu0 }
 0x1dc   : > { %v513_v59 = vpop.f32.mrf.mxu2 }
 0x1dd   : > { %v514_v60 = vadd.f32 %v1148_v28, %v513_v59 }
 0x1df   : > { %v523_v61 = vmax.f32 %v514_v60, 0.0  ;;  %v832_v60 = vld [vmem:[%s1557_s4 + $0x20] sm:$0xff] }
 0x1e0   : > { %875 = vmatpush.msrb.mxu3 %v832_v60 }
 0x1e1   : > { %1051 = vmatmul.msk.f32.gmra.mxu3 %vm366_vm1, %v523_v61 }
 0x22c   : > { %v576_v4 = vpop.f32.mrf.mxu3 }
 0x22d   : > { %v577_v5 = vadd.f32 %v1149_v3, %v576_v4  ;;  %v830_v4 = vld [vmem:[%s1557_s4 + $0x10] sm:$0xff] }
 0x22f   : > { %v600_v62 = vmax.f32 %v577_v5, 0.0 }
 0x231   : > { %1062 = vmatmul.msk.f32.vlgmr.msrb.gmra.mxu1 %vm366_vm1, %v600_v62 }
 0x234   : > { %v579_v63 = vpop.f32.mrf.mxu3 }
 0x235   : > { %v580_v10 = vadd.f32 %v1149_v3, %v579_v63  ;;  %v829_v63 = vld [vmem:[%s1557_s4 + $0x8] sm:$0xff] }
 0x237   : > { %v601_v0 = vmax.f32 %v580_v10, 0.0 }
 0x239   : > { %1063 = vmatmul.msk.f32.gmra.mxu1 %vm366_vm1, %v601_v0  ;;  %v828_v0 = vld [vmem:[%s1557_s4] sm:$0xff] }
 0x23c   : > { %v582_v12 = vpop.f32.mrf.mxu3 }
 0x23d   : > { %v583_v1 = vadd.f32 %v1149_v3, %v582_v12  ;;  %v655_v12 = vpop.f32.mrf.mxu0 }
 0x23f   : > { %v602_v13 = vmax.f32 %v583_v1, 0.0 }
 0x241   : > { %1064 = vmatmul.msk.f32.gmra.mxu1 %vm366_vm1, %v602_v13 }
 0x244   : > { %v585_v14 = vpop.f32.mrf.mxu3 }
 0x245   : > { %v586_v6 = vadd.f32 %v1149_v3, %v585_v14  ;;  %v658_v8 = vpop.f32.mrf.mxu0 }
 0x247   : > { %v603_v7 = vmax.f32 %v586_v6, 0.0 }
 0x249   : > { %1065 = vmatmul.msk.f32.gmra.mxu1 %vm366_vm1, %v603_v7 }
 0x24c   : > { %v588_v15 = vpop.f32.mrf.mxu3 }
 0x24d   : > { %v589_v16 = vadd.f32 %v1149_v3, %v588_v15 }
 0x24f   : > { %v604_v18 = vmax.f32 %v589_v16, 0.0 }
 0x251   : > { %1066 = vmatmul.msk.f32.gmra.mxu1 %vm366_vm1, %v604_v18 }
 0x254   : > { %v591_v22 = vpop.f32.mrf.mxu3 }
 0x255   : > { %v592_v23 = vadd.f32 %v1149_v3, %v591_v22 }
 0x257   : > { %v605_v25 = vmax.f32 %v592_v23, 0.0 }
 0x259   : > { %1067 = vmatmul.msk.f32.gmra.mxu1 %vm366_vm1, %v605_v25 }
 0x25c   : > { %v594_v26 = vpop.f32.mrf.mxu3 }
 0x25d   : > { %v595_v27 = vadd.f32 %v1149_v3, %v594_v26 }
 0x25f   : > { %v606_v28 = vmax.f32 %v595_v27, 0.0 }
 0x261   : > { %1068 = vmatmul.msk.f32.gmra.mxu1 %vm366_vm1, %v606_v28 }
 0x264   : > { %v597_v29 = vpop.f32.mrf.mxu3 }
 0x265   : > { %v598_v30 = vadd.f32 %v1149_v3, %v597_v29  ;;  %v831_v3 = vld [vmem:[%s1557_s4 + $0x18] sm:$0xff] }
 0x266   : > { %876 = vmatpush.msrb.mxu3 %v831_v3 }
 0x267   : > { %v607_v31 = vmax.f32 %v598_v30, 0.0 }
 0x268   : > { %877 = vmatpush.msrb.mxu3 %v830_v4 }
 0x269   : > { %1069 = vmatmul.msk.f32.gmra.mxu1 %vm366_vm1, %v607_v31 }
 0x26a   : > { %878 = vmatpush.msrb.mxu3 %v829_v63 }
 0x26c   : > { %879 = vmatpush.msrb.mxu3 %v828_v0 }
 0x2ae   : > { %v702_v35 = vpop.f32.mrf.mxu1 }
 0x2af   : > { %v703_v36 = vadd.f32 %v702_v35, %v637_v32 }
 0x2b1   : > { %v728_v37 = vadd.f32 %v1150_v34, %v703_v36 }
 0x2b3   : > { %v736_v39 = vmax.f32 %v728_v37, 0.0 }
 0x2b5   : > { %1070 = vmatmul.msk.f32.vlgmr.msrb.gmra.mxu2 %vm366_vm1, %v736_v39 }
 0x2b6   : > { %v705_v40 = vpop.f32.mrf.mxu1 }
 0x2b7   : > { %v706_v41 = vadd.f32 %v705_v40, %v640_v33 }
 0x2b9   : > { %v729_v42 = vadd.f32 %v1150_v34, %v706_v41 }
 0x2bb   : > { %v737_v43 = vmax.f32 %v729_v42, 0.0  ;;  %v1152_v42 = vld [vmem:[%s1558_s5] ss:$0 sm:$0xff] }
 0x2bd   : > { %1071 = vmatmul.msk.f32.gmra.mxu2 %vm366_vm1, %v737_v43 }
 0x2be   : > { %v708_v45 = vpop.f32.mrf.mxu1 }
 0x2bf   : > { %v709_v46 = vadd.f32 %v708_v45, %v643_v38 }
 0x2c1   : > { %v730_v47 = vadd.f32 %v1150_v34, %v709_v46 }
 0x2c3   : > { %v738_v48 = vmax.f32 %v730_v47, 0.0 }
 0x2c5   : > { %1072 = vmatmul.msk.f32.gmra.mxu2 %vm366_vm1, %v738_v48 }
 0x2c6   : > { %v711_v49 = vpop.f32.mrf.mxu1 }
 0x2c7   : > { %v712_v51 = vadd.f32 %v711_v49, %v646_v44 }
 0x2c9   : > { %v731_v52 = vadd.f32 %v1150_v34, %v712_v51 }
 0x2cb   : > { %v739_v53 = vmax.f32 %v731_v52, 0.0 }
 0x2cd   : > { %1073 = vmatmul.msk.f32.gmra.mxu2 %vm366_vm1, %v739_v53 }
 0x2ce   : > { %v714_v56 = vpop.f32.mrf.mxu1 }
 0x2cf   : > { %v715_v2 = vadd.f32 %v714_v56, %v649_v50 }
 0x2d1   : > { %v732_v59 = vadd.f32 %v1150_v34, %v715_v2 }
 0x2d3   : > { %v740_v61 = vmax.f32 %v732_v59, 0.0 }
 0x2d5   : > { %1074 = vmatmul.msk.f32.gmra.mxu2 %vm366_vm1, %v740_v61 }
 0x2d6   : > { %v717_v5 = vpop.f32.mrf.mxu1 }
 0x2d7   : > { %v718_v62 = vadd.f32 %v717_v5, %v652_v58 }
 0x2d9   : > { %v733_v10 = vadd.f32 %v1150_v34, %v718_v62 }
 0x2db   : > { %v741_v1 = vmax.f32 %v733_v10, 0.0 }
 0x2dd   : > { %1075 = vmatmul.msk.f32.gmra.mxu2 %vm366_vm1, %v741_v1 }
 0x2de   : > { %v720_v13 = vpop.f32.mrf.mxu1 }
 0x2df   : > { %v721_v14 = vadd.f32 %v720_v13, %v655_v12 }
 0x2e1   : > { %v734_v6 = vadd.f32 %v1150_v34, %v721_v14 }
 0x2e3   : > { %v742_v7 = vmax.f32 %v734_v6, 0.0 }
 0x2e5   : > { %1076 = vmatmul.msk.f32.gmra.mxu2 %vm366_vm1, %v742_v7 }
 0x2e6   : > { %v723_v9 = vpop.f32.mrf.mxu1 }
 0x2e7   : > { %v724_v11 = vadd.f32 %v723_v9, %v658_v8 }
 0x2e9   : > { %v735_v15 = vadd.f32 %v1150_v34, %v724_v11 }
 0x2eb   : > { %v743_v16 = vmax.f32 %v735_v15, 0.0 }
 0x2ed   : > { %1077 = vmatmul.msk.f32.gmra.mxu2 %vm366_vm1, %v743_v16 }
 0x338   : > { %v796_v18 = vpop.f32.mrf.mxu2 }
 0x339   : > { %v797_v19 = vadd.f32 %v1151_v17, %v796_v18 }
 0x33b   : > { %v820_v20 = vmax.f32 %v797_v19, 0.0 }
 0x33d   : > { %1078 = vmatmul.msk.f32.vlgmr.msrb.gmra.mxu3 %vm366_vm1, %v820_v20 }
 0x340   : > { %v799_v21 = vpop.f32.mrf.mxu2 }
 0x341   : > { %v800_v22 = vadd.f32 %v1151_v17, %v799_v21 }
 0x343   : > { %v821_v23 = vmax.f32 %v800_v22, 0.0 }
 0x345   : > { %1079 = vmatmul.msk.f32.gmra.mxu3 %vm366_vm1, %v821_v23 }
 0x348   : > { %v802_v24 = vpop.f32.mrf.mxu2 }
 0x349   : > { %v803_v25 = vadd.f32 %v1151_v17, %v802_v24 }
 0x34b   : > { %v822_v26 = vmax.f32 %v803_v25, 0.0 }
 0x34d   : > { %1080 = vmatmul.msk.f32.gmra.mxu3 %vm366_vm1, %v822_v26 }
 0x350   : > { %v805_v27 = vpop.f32.mrf.mxu2 }
 0x351   : > { %v806_v28 = vadd.f32 %v1151_v17, %v805_v27 }
 0x353   : > { %v823_v29 = vmax.f32 %v806_v28, 0.0 }
 0x355   : > { %1081 = vmatmul.msk.f32.gmra.mxu3 %vm366_vm1, %v823_v29 }
 0x358   : > { %v808_v30 = vpop.f32.mrf.mxu2 }
 0x359   : > { %v809_v31 = vadd.f32 %v1151_v17, %v808_v30 }
 0x35b   : > { %v824_v32 = vmax.f32 %v809_v31, 0.0 }
 0x35d   : > { %1082 = vmatmul.msk.f32.gmra.mxu3 %vm366_vm1, %v824_v32 }
 0x360   : > { %v811_v33 = vpop.f32.mrf.mxu2 }
 0x361   : > { %v812_v34 = vadd.f32 %v1151_v17, %v811_v33 }
 0x363   : > { %v825_v35 = vmax.f32 %v812_v34, 0.0 }
 0x365   : > { %1083 = vmatmul.msk.f32.gmra.mxu3 %vm366_vm1, %v825_v35 }
 0x368   : > { %v814_v36 = vpop.f32.mrf.mxu2 }
 0x369   : > { %v815_v37 = vadd.f32 %v1151_v17, %v814_v36 }
 0x36b   : > { %v826_v38 = vmax.f32 %v815_v37, 0.0 }
 0x36d   : > { %1084 = vmatmul.msk.f32.gmra.mxu3 %vm366_vm1, %v826_v38 }
 0x370   : > { %v817_v39 = vpop.f32.mrf.mxu2 }
 0x371   : > { %v818_v40 = vadd.f32 %v1151_v17, %v817_v39 }
 0x373   : > { %v827_v41 = vmax.f32 %v818_v40, 0.0 }
 0x375   : > { %1085 = vmatmul.msk.f32.gmra.mxu3 %vm366_vm1, %v827_v41 }
 0x3c0   : > { %v881_v43 = vpop.f32.mrf.mxu3 }
 0x3c1   : > { %v882_v44 = vadd.f32 %v1152_v42, %v881_v43 }
 0x3c3   : > { %v905_v45 = vmax.f32 %v882_v44, 0.0 }
 0x3c5   : > { %913 = vst [vmem:[%s1509_s16] sm:$0xff] %v905_v45 }
 0x3c8   : > { %v884_v46 = vpop.f32.mrf.mxu3 }
 0x3c9   : > { %v885_v47 = vadd.f32 %v1152_v42, %v884_v46 }
 0x3cb   : > { %v906_v48 = vmax.f32 %v885_v47, 0.0 }
 0x3cd   : > { %914 = vst [vmem:[%s1509_s16 + $0x8] sm:$0xff] %v906_v48 }
 0x3d0   : > { %v887_v49 = vpop.f32.mrf.mxu3 }
 0x3d1   : > { %v888_v50 = vadd.f32 %v1152_v42, %v887_v49 }
 0x3d3   : > { %v907_v51 = vmax.f32 %v888_v50, 0.0 }
 0x3d5   : > { %915 = vst [vmem:[%s1509_s16 + $0x10] sm:$0xff] %v907_v51 }
 0x3d8   : > { %v890_v52 = vpop.f32.mrf.mxu3 }
 0x3d9   : > { %v891_v53 = vadd.f32 %v1152_v42, %v890_v52 }
 0x3db   : > { %v908_v54 = vmax.f32 %v891_v53, 0.0 }
 0x3dd   : > { %916 = vst [vmem:[%s1509_s16 + $0x18] sm:$0xff] %v908_v54 }
 0x3e0   : > { %v893_v55 = vpop.f32.mrf.mxu3 }
 0x3e1   : > { %v894_v56 = vadd.f32 %v1152_v42, %v893_v55 }
 0x3e3   : > { %v909_v2 = vmax.f32 %v894_v56, 0.0 }
 0x3e5   : > { %917 = vst [vmem:[%s1509_s16 + $0x20] sm:$0xff] %v909_v2 }
 0x3e8   : > { %v896_v57 = vpop.f32.mrf.mxu3 }
 0x3e9   : > { %v897_v58 = vadd.f32 %v1152_v42, %v896_v57 }
 0x3eb   : > { %v910_v59 = vmax.f32 %v897_v58, 0.0 }
 0x3ed   : > { %918 = vst [vmem:[%s1509_s16 + $0x28] sm:$0xff] %v910_v59 }
 0x3f0   : > { %v899_v60 = vpop.f32.mrf.mxu3 }
 0x3f1   : > { %v900_v61 = vadd.f32 %v1152_v42, %v899_v60 }
 0x3f3   : > { %v911_v3 = vmax.f32 %v900_v61, 0.0 }
 0x3f5   : > { %919 = vst [vmem:[%s1509_s16 + $0x30] sm:$0xff] %v911_v3 }
 0x3f8   : > { %v902_v4 = vpop.f32.mrf.mxu3 }
 0x3f9   : > { %v903_v5 = vadd.f32 %v1152_v42, %v902_v4 }
 0x3fb   : > { %v912_v62 = vmax.f32 %v903_v5, 0.0 }
 0x3fd   : > { %920 = vst [vmem:[%s1509_s16 + $0x38] sm:$0xff] %v912_v62 }
 0x3fe   : > { %1210 = shalt.err (!%p1207_p8)
}
 0x3ff   : > { %s1254_s12 = smov 128   ;;  %s1255_s16 = smov 8  }
 0x400   : > { %1096 = dma.vmem_to_hbm [thread:$0]  (%p1329_p5), %s935_s26, 1024, %s937_s28, %s922_s29, %s1254_s12, %s1254_s12, %s1255_s16  }
 0x401 PF: > { %p1108_p9 = scmp.ge.s32.totalorder %s1249_s24, 2  ;;  %s951_s17 = sand.u32 1, %s1237_s21  }
 0x402   : > { %s952_s18 = scalar_lea.sflag [#allocation4], %s951_s17 }
 0x403   : > { %p1103_p10 = pnand %p1108_p9, %p1333_p6 }
 0x405   : > { %p1104_p11 = pneg %p1103_p10 }
 0x407   : > { %1232 = dma.done.wait (%p1104_p11), %s952_s18, 1024  }
 0x408   : > { %1234 = vsyncadd (%p1104_p11), %s952_s18, 4294966272  ;;  %p17_p12 = scmp.ge.s32.totalorder %s1316_s27, 4   ;;  %s1562_s21 = smov %s1241_s22 }
 0x409   : > { %s1563_s22 = smov %s1245_s23  ;;  %s1564_s23 = smov %s1327_s30 }
 0x40a   : > { %s1565_s24 = smov %s1316_s27  ;;  %19 = sbr.rel (!%p17_p12) target bundleno = 4 (0x4), region = 89 }
 0x40f   :  { %958 = vsyncpa [#allocation3], 1 }
 0x410   :  { %960 = vsyncpa [#allocation3 + $0x1], 1 }
 0x411   :  { %961 = vsyncpa [#allocation4], 1 }
 0x412   :  { %963 = vsyncpa [#allocation4 + $0x1], 1 }

</bundles_post_ra>
